<compile_context>
chip_gen: v5e
topology: v5e:2x2
jax: 0.10.0
libtpu: 0.0.40
codegen_flags: <defaults>
</compile_context>

<pallas_src>
import math

import jax
import jax.numpy as jnp
from jax.experimental import pallas as pl
from jax.experimental.pallas import tpu as pltpu

# ------------------------- model hyper-parameters -------------------------
D_MODEL = 32
DIM_FF = 128          # small but lane-dense hidden width
SEQ = 8
BATCH = 2
LN_EPS = 1e-5


# ------------------------------- kernel -----------------------------------
def _ffn_kernel(x_ref, w1_ref, b1_ref, w2_ref, vecs_ref, out_ref):
    """Processes a (rows, E) slab: linear1 -> relu -> linear2 -> +residual -> LayerNorm.

    w1_ref: (E, F)   pre-transposed weight of linear1
    b1_ref: (1, F)   bias of linear1
    w2_ref: (F, E)   pre-transposed weight of linear2
    vecs_ref: (3, E) rows = [b2, ln_gamma, ln_beta]
    """
    x = x_ref[...].astype(jnp.float32)                                  # (rows, E)

    # linear1 + ReLU (single MXU push; weight already (in, out))
    h = jnp.dot(x, w1_ref[...], preferred_element_type=jnp.float32) + b1_ref[...]
    h = jnp.maximum(h, 0.0)

    # linear2
    y2 = jnp.dot(h, w2_ref[...], preferred_element_type=jnp.float32) + vecs_ref[0:1, :]

    # residual + LayerNorm over feature axis
    y = x + y2
    mu = jnp.mean(y, axis=-1, keepdims=True)
    var = jnp.mean((y - mu) ** 2, axis=-1, keepdims=True)
    y_norm = (y - mu) * jax.lax.rsqrt(var + LN_EPS)
    out_ref[...] = (y_norm * vecs_ref[1:2, :] + vecs_ref[2:3, :]).astype(out_ref.dtype)


# ------------------------------ wrapper ------------------------------------
def _use_batch_grid():
    """v7x has 2 TensorCores per chip: keep a parallel batch grid there.
    Single-TC chips (v5e / v6e): fold everything into one kernel step."""
    try:
        kind = jax.devices()[0].device_kind.lower()
        return ("v7" in kind) or ("7x" in kind)
    except Exception:
        return False


_BATCH_GRID = _use_batch_grid()


@jax.jit
def ffn_layer(tgt, params):
    """tgt: (L, N, E) sequence-first (PyTorch layout). Returns (L, N, E)."""
    L, N, E = tgt.shape
    w1t, b1, w2t, vecs = params["w1t"], params["b1"], params["w2t"], params["vecs"]
    F = w1t.shape[1]

    if _BATCH_GRID and N > 1:
        # v7x: one batch element per grid step, parallel axis -> both TensorCores.
        x_b = jnp.transpose(tgt, (1, 0, 2))                             # (N, L, E)
        out = pl.pallas_call(
            _ffn_kernel,
            out_shape=jax.ShapeDtypeStruct((N, L, E), tgt.dtype),
            grid=(N,),
            in_specs=[
                pl.BlockSpec((None, L, E), lambda b: (b, 0, 0)),        # x (squeezed batch)
                pl.BlockSpec((E, F), lambda b: (0, 0)),                 # W1^T
                pl.BlockSpec((1, F), lambda b: (0, 0)),                 # b1
                pl.BlockSpec((F, E), lambda b: (0, 0)),                 # W2^T
                pl.BlockSpec((3, E), lambda b: (0, 0)),                 # [b2; gamma; beta]
            ],
            out_specs=pl.BlockSpec((None, L, E), lambda b: (b, 0, 0)),
            compiler_params=pltpu.CompilerParams(
                dimension_semantics=("parallel",)),
        )(x_b, w1t, b1, w2t, vecs)
        return jnp.transpose(out, (1, 0, 2))

    # v5e / v6e (single TC): fold (L, N) -> rows, single kernel invocation.
    x2d = tgt.reshape(L * N, E)
    out = pl.pallas_call(
        _ffn_kernel,
        out_shape=jax.ShapeDtypeStruct((L * N, E), tgt.dtype),
    )(x2d, w1t, b1, w2t, vecs)
    return out.reshape(L, N, E)


# --------------------------- parameter init ---------------------------------
def init_params(key, d_model, dim_ff):
    """Xavier-uniform weights (stored pre-transposed, (in, out)), small random
    biases, identity LayerNorm affine (matches nn.Linear + nn.LayerNorm after
    FFNLayer._reset_parameters, which only xavier-inits 2-D params)."""
    k1, k2, k3, k4 = jax.random.split(key, 4)
    lim = math.sqrt(6.0 / (d_model + dim_ff))   # symmetric fan-in/fan-out bound

    w1t = jax.random.uniform(k1, (d_model, dim_ff), jnp.float32, -lim, lim)   # linear1.weight.T
    w2t = jax.random.uniform(k2, (dim_ff, d_model), jnp.float32, -lim, lim)   # linear2.weight.T
    b1 = jax.random.uniform(k3, (1, dim_ff), jnp.float32, -0.1, 0.1)
    b2 = jax.random.uniform(k4, (1, d_model), jnp.float32, -0.1, 0.1)
    gamma = jnp.ones((1, d_model), jnp.float32)
    beta = jnp.zeros((1, d_model), jnp.float32)

    vecs = jnp.concatenate([b2, gamma, beta], axis=0)                         # (3, E)
    return {"w1t": w1t, "b1": b1, "w2t": w2t, "vecs": vecs,
            "b2": b2, "gamma": gamma, "beta": beta}


# --------------------------- pure-JAX reference ------------------------------
def reference(tgt, params):
    x = tgt.astype(jnp.float32)                                  # (L, N, E)
    h = jnp.maximum(x @ params["w1t"] + params["b1"][0], 0.0)
    y2 = h @ params["w2t"] + params["b2"][0]
    y = x + y2
    mu = jnp.mean(y, axis=-1, keepdims=True)
    var = jnp.mean((y - mu) ** 2, axis=-1, keepdims=True)
    return (y - mu) / jnp.sqrt(var + LN_EPS) * params["gamma"][0] + params["beta"][0]


# --------------------------------- main --------------------------------------
if __name__ == "__main__":
    key = jax.random.PRNGKey(0)
    k_tgt, k_par = jax.random.split(key)

    tgt = jax.random.normal(k_tgt, (SEQ, BATCH, D_MODEL), jnp.float32)   # (L, N, E)
    params = init_params(k_par, D_MODEL, DIM_FF)

    out = ffn_layer(tgt, params)
    jax.block_until_ready(out)

    ref = reference(tgt, params)
    assert out.shape == (SEQ, BATCH, D_MODEL)
    assert jnp.allclose(out, ref, atol=1e-4, rtol=1e-4), "mismatch vs reference"

    print("KERNEL_OK")
</pallas_src>

<mosaic_0001>
module attributes {stable_mosaic.version = 11 : i64} {
  func.func @_ffn_kernel(%arg0: memref<16x32xf32, #tpu.memory_space<vmem>>, %arg1: memref<32x128xf32, #tpu.memory_space<vmem>>, %arg2: memref<1x128xf32, #tpu.memory_space<vmem>>, %arg3: memref<128x32xf32, #tpu.memory_space<vmem>>, %arg4: memref<3x32xf32, #tpu.memory_space<vmem>>, %arg5: memref<16x32xf32, #tpu.memory_space<vmem>>) attributes {dimension_semantics = [], scalar_prefetch = 0 : i64, scratch_operands = 0 : i64, tpu.core_type = #tpu.core_type<tc>} {
    %c0 = arith.constant 0 : index
    %c0_0 = arith.constant 0 : index
    %0 = vector.load %arg0[%c0, %c0_0] : memref<16x32xf32, #tpu.memory_space<vmem>>, vector<16x32xf32>
    %c0_1 = arith.constant 0 : index
    %c0_2 = arith.constant 0 : index
    %1 = vector.load %arg1[%c0_1, %c0_2] : memref<32x128xf32, #tpu.memory_space<vmem>>, vector<32x128xf32>
    %cst = arith.constant dense<0.000000e+00> : vector<16x128xf32>
    %2 = tpu.matmul %0, %1, %cst {dimension_numbers = #tpu.dot_dimension_numbers<[1], [0], [0], [1], [0, 0, 1, 1], [], []>} : vector<16x32xf32>, vector<32x128xf32>, vector<16x128xf32> -> vector<16x128xf32>
    %c0_3 = arith.constant 0 : index
    %c0_4 = arith.constant 0 : index
    %3 = vector.load %arg2[%c0_3, %c0_4] : memref<1x128xf32, #tpu.memory_space<vmem>>, vector<1x128xf32>
    %4 = vector.broadcast %3 : vector<1x128xf32> to vector<16x128xf32>
    %5 = arith.addf %2, %4 : vector<16x128xf32>
    %cst_5 = arith.constant 0.000000e+00 : f32
    %6 = vector.broadcast %cst_5 : f32 to vector<16x128xf32>
    %7 = arith.maximumf %5, %6 : vector<16x128xf32>
    %c0_6 = arith.constant 0 : index
    %c0_7 = arith.constant 0 : index
    %8 = vector.load %arg3[%c0_6, %c0_7] : memref<128x32xf32, #tpu.memory_space<vmem>>, vector<128x32xf32>
    %cst_8 = arith.constant dense<0.000000e+00> : vector<16x32xf32>
    %9 = tpu.matmul %7, %8, %cst_8 {dimension_numbers = #tpu.dot_dimension_numbers<[1], [0], [0], [1], [0, 0, 1, 1], [], []>} : vector<16x128xf32>, vector<128x32xf32>, vector<16x32xf32> -> vector<16x32xf32>
    %c0_9 = arith.constant 0 : index
    %c0_10 = arith.constant 0 : index
    %10 = vector.load %arg4[%c0_9, %c0_10] : memref<3x32xf32, #tpu.memory_space<vmem>>, vector<1x32xf32>
    %11 = vector.broadcast %10 : vector<1x32xf32> to vector<16x32xf32>
    %12 = arith.addf %9, %11 : vector<16x32xf32>
    %13 = arith.addf %0, %12 : vector<16x32xf32>
    %cst_11 = arith.constant dense<0.000000e+00> : vector<16xf32>
    %14 = vector.multi_reduction <add>, %13, %cst_11 [1] : vector<16x32xf32> to vector<16xf32>
    %15 = vector.shape_cast %14 : vector<16xf32> to vector<16x1xf32>
    %cst_12 = arith.constant 3.200000e+01 : f32
    %16 = vector.broadcast %cst_12 : f32 to vector<16x1xf32>
    %17 = arith.divf %15, %16 : vector<16x1xf32>
    %18 = vector.broadcast %17 : vector<16x1xf32> to vector<16x32xf32>
    %19 = arith.subf %13, %18 : vector<16x32xf32>
    %20 = arith.mulf %19, %19 : vector<16x32xf32>
    %cst_13 = arith.constant dense<0.000000e+00> : vector<16xf32>
    %21 = vector.multi_reduction <add>, %20, %cst_13 [1] : vector<16x32xf32> to vector<16xf32>
    %22 = vector.shape_cast %21 : vector<16xf32> to vector<16x1xf32>
    %cst_14 = arith.constant 3.200000e+01 : f32
    %23 = vector.broadcast %cst_14 : f32 to vector<16x1xf32>
    %24 = arith.divf %22, %23 : vector<16x1xf32>
    %25 = vector.broadcast %17 : vector<16x1xf32> to vector<16x32xf32>
    %26 = arith.subf %13, %25 : vector<16x32xf32>
    %cst_15 = arith.constant 9.99999974E-6 : f32
    %27 = vector.broadcast %cst_15 : f32 to vector<16x1xf32>
    %28 = arith.addf %24, %27 : vector<16x1xf32>
    %29 = math.rsqrt %28 : vector<16x1xf32>
    %30 = vector.broadcast %29 : vector<16x1xf32> to vector<16x32xf32>
    %31 = arith.mulf %26, %30 : vector<16x32xf32>
    %c1 = arith.constant 1 : index
    %c0_16 = arith.constant 0 : index
    %32 = vector.load %arg4[%c1, %c0_16] : memref<3x32xf32, #tpu.memory_space<vmem>>, vector<1x32xf32>
    %33 = vector.broadcast %32 : vector<1x32xf32> to vector<16x32xf32>
    %34 = arith.mulf %31, %33 : vector<16x32xf32>
    %c2 = arith.constant 2 : index
    %c0_17 = arith.constant 0 : index
    %35 = vector.load %arg4[%c2, %c0_17] : memref<3x32xf32, #tpu.memory_space<vmem>>, vector<1x32xf32>
    %36 = vector.broadcast %35 : vector<1x32xf32> to vector<16x32xf32>
    %37 = arith.addf %34, %36 : vector<16x32xf32>
    %c0_18 = arith.constant 0 : index
    %c0_19 = arith.constant 0 : index
    %38 = vector.load %arg5[%c0_18, %c0_19] : memref<16x32xf32, #tpu.memory_space<vmem>>, vector<16x32xf32>
    tpu.vector_store %arg5[%c0_18, %c0_19], %37 {strides = array<i32>} : memref<16x32xf32, #tpu.memory_space<vmem>>, vector<16x32xf32>,
    return
  }
}

</mosaic_0001>

<bundles_post_ra>
// kernel: ffn_layer.1
= control target key start
LH: loop header
LB: loop body
LE: loop exit
PB: predicated region body
PF: predicated region fallthrough
CT: control target
= control target key end

     0   :  { %vm31_vm0 = vcmask 261120   ;;  %s366_s0 = inlined_call_operand.vmem [shape: f32[16,32], index: 0, kind: input, shape index: {}]   ;;  %s367_s1 = inlined_call_operand.vmem [shape: f32[32,128], index: 1, kind: input, shape index: {}]   ;;  %s368_s2 = inlined_call_operand.vmem [shape: f32[1,128], index: 2, kind: input, shape index: {}]   ;;  %s369_s3 = inlined_call_operand.vmem [shape: f32[128,32], index: 3, kind: input, shape index: {}]   ;;  %s370_s4 = inlined_call_operand.vmem [shape: f32[3,32], index: 4, kind: input, shape index: {}]   ;;  %s371_s5 = inlined_call_operand.hbm [shape: f32[16,32], index: 5, kind: output, shape index: {}]  }
   0x1   :  { %v26_v0 = vld [vmem:[%s367_s1 + $0x18] sm:$0xff]  ;;  %v25_v1 = vld [vmem:[%s367_s1 + $0x10] sm:$0xff]  ;;  %v24_v2 = vld [vmem:[%s367_s1 + $0x8] sm:$0xff] }
   0x2   :  { %50 = vmatpush.msra.mxu0 %v26_v0  ;;  %v78_v3 = vld [vmem:[%s369_s3 + $0x78] sm:$0xff]  ;;  %v77_v4 = vld [vmem:[%s369_s3 + $0x70] sm:$0xff]  ;;  %v23_v5 = vld [vmem:[%s367_s1] sm:$0xff] }
   0x3   :  { %81 = vmatpush.msra.mxu1 %v78_v3  ;;  %v76_v6 = vld [vmem:[%s369_s3 + $0x68] sm:$0xff]  ;;  %187 = vmatpush.msra.mxu2 %v78_v3  ;;  %v21_v7 = vld [vmem:[%s366_s0] sm:$0xff] }
   0x4   :  { %51 = vmatpush.msra.mxu0 %v25_v1  ;;  %v75_v8 = vld [vmem:[%s369_s3 + $0x60] sm:$0xff] }
   0x5   :  { %82 = vmatpush.msra.mxu1 %v77_v4  ;;  %188 = vmatpush.msra.mxu2 %v77_v4 }
   0x6   :  { %52 = vmatpush.msra.mxu0 %v24_v2 }
   0x7   :  { %83 = vmatpush.msra.mxu1 %v76_v6 }
   0x8   :  { %53 = vmatpush.msra.mxu0 %v23_v5 }
   0x9   :  { %10 = vsyncpa [#allocation3], 0  ;;  %185 = vmatmul.msk.f32.vlgmr.msra.gmra.mxu0 %vm31_vm0, %v21_v7  ;;  %v74_v9 = vld [vmem:[%s369_s3 + $0x58] sm:$0xff]  ;;  %189 = vmatpush.msra.mxu2 %v76_v6  ;;  %v73_v10 = vld [vmem:[%s369_s3 + $0x50] sm:$0xff]  ;;  %v243_v38 = vmov 32.0   ;;  %s244_s15 = smov [#allocation2]  }
   0xa   :  { %84 = vmatpush.msra.mxu1 %v75_v8  ;;  %v72_v11 = vld [vmem:[%s369_s3 + $0x48] sm:$0xff]  ;;  %v71_v13 = vld [vmem:[%s369_s3 + $0x40] sm:$0xff]  ;;  %v70_v14 = vld [vmem:[%s369_s3 + $0x38] sm:$0xff]  ;;  %211 = vrcp.f32 %v243_v38  ;;  %s171_s16 = sshll.u32 %s244_s15, 4  ;;  %s245_s19 = smov 128   ;;  %s172_s16 = int_to_ptr.vmem [resolvable:$true] %s171_s16 }
   0xb   :  { %190 = vmatpush.msra.mxu2 %v75_v8  ;;  %v22_v12 = vld [vmem:[%s366_s0 + $0x8] sm:$0xff]  ;;  %v69_v15 = vld [vmem:[%s369_s3 + $0x30] sm:$0xff]  ;;  %v67_v17 = vld [vmem:[%s369_s3 + $0x20] sm:$0xff]  ;;  %s246_s20 = smov 8  }
   0xc   :  { %85 = vmatpush.msra.mxu1 %v74_v9  ;;  %v68_v16 = vld [vmem:[%s369_s3 + $0x28] sm:$0xff]  ;;  %v66_v18 = vld [vmem:[%s369_s3 + $0x18] sm:$0xff]  ;;  %v65_v19 = vld [vmem:[%s369_s3 + $0x10] sm:$0xff] }
   0xd   :  { %191 = vmatpush.msra.mxu2 %v74_v9  ;;  %v64_v20 = vld [vmem:[%s369_s3 + $0x8] sm:$0xff]  ;;  %v63_v21 = vld [vmem:[%s369_s3] sm:$0xff] }
   0xe   :  { %86 = vmatpush.msra.mxu1 %v73_v10  ;;  %v207_v22 = vld [vmem:[%s368_s2] ss:$0 sm:$0xff]  ;;  %v209_v3 = vld [vmem:[%s370_s4 + $0x1] ss:$0 sm:$0xff]  ;;  %v210_v6 = vld [vmem:[%s370_s4 + $0x2] ss:$0 sm:$0xff] }
   0xf   :  { %192 = vmatpush.msra.mxu2 %v73_v10  ;;  %v208_v29 = vld [vmem:[%s370_s4] ss:$0 sm:$0xff]  ;;  %s173_s4 = sshll.u32 %s371_s5, 4  ;;  %s174_s4 = int_to_ptr.hbm [resolvable:$true] %s173_s4 }
  0x10   :  { %87 = vmatpush.msra.mxu1 %v72_v11  ;;  %v212_v39 = vpop.eup %211 }
  0x11   :  { %186 = vmatmul.msk.f32.gmra.mxu0 %vm31_vm0, %v22_v12  ;;  %193 = vmatpush.msra.mxu2 %v72_v11  ;;  %v113_v40 = vmul.f32 32.0, %v212_v39  ;;  %vm117_vm1 = vweird.f32 %v212_v39 }
  0x12   :  { %88 = vmatpush.msra.mxu1 %v71_v13 }
  0x13   :  { %194 = vmatpush.msra.mxu2 %v71_v13  ;;  %v114_v41 = vsub.f32 1.0, %v113_v40 }
  0x14   :  { %89 = vmatpush.msra.mxu1 %v70_v14 }
  0x15   :  { %195 = vmatpush.msra.mxu2 %v70_v14  ;;  %v115_v42 = vmul.f32 %v212_v39, %v114_v41 }
  0x16   :  { %90 = vmatpush.msra.mxu1 %v69_v15 }
  0x17   :  { %196 = vmatpush.msra.mxu2 %v69_v15  ;;  %v116_v43 = vadd.f32 %v212_v39, %v115_v42 }
  0x18   :  { %91 = vmatpush.msra.mxu1 %v68_v16 }
  0x19   :  { %197 = vmatpush.msra.mxu2 %v68_v16  ;;  %v118_v44 = vsel %vm117_vm1, %v212_v39, %v116_v43 }
  0x1a   :  { %92 = vmatpush.msra.mxu1 %v67_v17 }
  0x1b   :  { %198 = vmatpush.msra.mxu2 %v67_v17 }
  0x1c   :  { %93 = vmatpush.msra.mxu1 %v66_v18 }
  0x1d   :  { %199 = vmatpush.msra.mxu2 %v66_v18 }
  0x1e   :  { %94 = vmatpush.msra.mxu1 %v65_v19 }
  0x1f   :  { %200 = vmatpush.msra.mxu2 %v65_v19 }
  0x20   :  { %95 = vmatpush.msra.mxu1 %v64_v20 }
  0x21   :  { %201 = vmatpush.msra.mxu2 %v64_v20 }
  0x22   :  { %96 = vmatpush.msra.mxu1 %v63_v21 }
  0x23   :  { %202 = vmatpush.msra.mxu2 %v63_v21 }
  0x86   :  { %v55_v23 = vpop.f32.mrf.mxu0 }
  0x87   :  { %v56_v24 = vadd.f32 %v207_v22, %v55_v23 }
  0x89   :  { %v61_v25 = vmax.f32 %v56_v24, 0.0 }
  0x8b   :  { %97 = vmatmul.f32.vlgmr.msra.gmra.mxu1 %v61_v25 }
  0x8e   :  { %v58_v26 = vpop.f32.mrf.mxu0 }
  0x8f   :  { %v59_v27 = vadd.f32 %v207_v22, %v58_v26 }
  0x91   :  { %v62_v28 = vmax.f32 %v59_v27, 0.0 }
  0x93   :  { %100 = vmatmul.f32.vlgmr.msra.gmra.mxu2 %v62_v28 }
 0x108   :  { %v98_v30 = vpop.f32.mrf.mxu1 }
 0x109   :  { %v99_v31 = vadd.f32 %v208_v29, %v98_v30 }
 0x10b   :  { %v104_v32 = vadd.f32 %v99_v31, %v21_v7 }
 0x10d   :  { %v106_v33 = vsel %vm31_vm0, %v104_v32, 0.0 }
 0x10e   :  { %107 = vadd.xlane.f32.xlu0 %v106_v33 }
 0x116   :  { %v101_v34 = vpop.f32.mrf.mxu2 }
 0x117   :  { %v102_v35 = vadd.f32 %v208_v29, %v101_v34 }
 0x119   :  { %v105_v36 = vadd.f32 %v102_v35, %v22_v12 }
 0x11b   :  { %v109_v37 = vsel %vm31_vm0, %v105_v36, 0.0 }
 0x11c   :  { %110 = vadd.xlane.f32.xlu0 %v109_v37 }
 0x181   :  { %v108_v45 = vpop.xlane.xlu0 %107 }
 0x182   :  { %v119_v46 = vmul.f32 %v118_v44, %v108_v45 }
 0x184   :  { %v121_v47 = vsub.f32 %v104_v32, %v119_v46 }
 0x186   :  { %v123_v48 = vmul.f32 %v121_v47, %v121_v47 }
 0x188   :  { %v125_v49 = vsel %vm31_vm0, %v123_v48, 0.0 }
 0x189   :  { %126 = vadd.xlane.f32.xlu1 %v125_v49 }
 0x18f   :  { %v111_v50 = vpop.xlane.xlu0 %110 }
 0x190   :  { %v120_v51 = vmul.f32 %v118_v44, %v111_v50 }
 0x192   :  { %v122_v52 = vsub.f32 %v105_v36, %v120_v51 }
 0x194   :  { %v124_v53 = vmul.f32 %v122_v52, %v122_v52 }
 0x196   :  { %v128_v54 = vsel %vm31_vm0, %v124_v53, 0.0 }
 0x197   :  { %129 = vadd.xlane.f32.xlu1 %v128_v54 }
 0x1fc   :  { %v127_v55 = vpop.xlane.xlu1 %126 }
 0x1fd   :  { %v131_v56 = vmul.f32 %v127_v55, %v118_v44 }
 0x1ff   :  { %v133_v57 = vadd.f32 1e-05, %v131_v56 }
 0x201   :  { %213 = vrsqrt.f32 %v133_v57  ;;  %vm141_vm3 = vweird.f32 %v133_v57 }
 0x207   :  { %v214_v58 = vpop.eup %213 }
 0x208   :  { %v136_v59 = vmul.f32 %v214_v58, %v133_v57  ;;  %vm142_vm2 = vweird.f32 %v214_v58 }
 0x209   :  { %vm143_vm4 = vmor %vm141_vm3, %vm142_vm2 }
 0x20a   :  { %v137_v60 = vmul.f32 %v214_v58, %v136_v59  ;;  %v130_v61 = vpop.xlane.xlu1 %129 }
 0x20b   :  { %v132_v62 = vmul.f32 %v130_v61, %v118_v44 }
 0x20c   :  { %v138_v63 = vmul.f32 0.5, %v137_v60 }
 0x20d   :  { %v134_v0 = vadd.f32 1e-05, %v132_v62 }
 0x20e   :  { %v139_v1 = vsub.f32 1.5, %v138_v63 }
 0x20f   :  { %215 = vrsqrt.f32 %v134_v0  ;;  %vm151_vm6 = vweird.f32 %v134_v0 }
 0x210   :  { %v140_v2 = vmul.f32 %v214_v58, %v139_v1 }
 0x212   :  { %v144_v4 = vsel %vm143_vm4, %v214_v58, %v140_v2 }
 0x213   :  { %v155_v5 = vmul.f32 %v144_v4, %v121_v47 }
 0x215   :  { %v216_v7 = vpop.eup %215  ;;  %v159_v8 = vmul.f32 %v209_v3, %v155_v5 }
 0x216   :  { %v146_v9 = vmul.f32 %v216_v7, %v134_v0  ;;  %vm152_vm5 = vweird.f32 %v216_v7 }
 0x217   :  { %v163_v10 = vadd.f32 %v210_v6, %v159_v8  ;;  %vm153_vm7 = vmor %vm151_vm6, %vm152_vm5 }
 0x218   :  { %v147_v11 = vmul.f32 %v216_v7, %v146_v9 }
 0x219   :  { %165 = vst.msk [vmem:[#allocation2] sm:$0xff] %vm31_vm0, %v163_v10 }
 0x21a   :  { %v148_v12 = vmul.f32 0.5, %v147_v11 }
 0x21c   :  { %v149_v13 = vsub.f32 1.5, %v148_v12 }
 0x21e   :  { %v150_v14 = vmul.f32 %v216_v7, %v149_v13 }
 0x220   :  { %v154_v15 = vsel %vm153_vm7, %v216_v7, %v150_v14 }
 0x221   :  { %v156_v16 = vmul.f32 %v154_v15, %v122_v52 }
 0x223   :  { %v160_v17 = vmul.f32 %v209_v3, %v156_v16 }
 0x225   :  { %v164_v18 = vadd.f32 %v210_v6, %v160_v17 }
 0x227   :  { %166 = vst.msk [vmem:[#allocation2 + $0x8] sm:$0xff] %vm31_vm0, %v164_v18 }
 0x228   :  { %179 = dma.vmem_to_hbm [thread:$0]  %s172_s16, 256, %s174_s4, [#allocation3], %s245_s19, %s245_s19, %s246_s20  }
 0x229   :  { %241 = dma.done.wait [#allocation3], 256  }
 0x22a   :  { %242 = vsyncadd [#allocation3], 4294967040 }
 0x22b   :  { %184 = vsyncpa [#allocation3], 1 }

</bundles_post_ra>
